<compile_context>
chip_gen: v7x
topology: tpu7x:2x2x1
jax: 0.10.0
libtpu: 0.0.40
codegen_flags: <defaults>
</compile_context>

<pallas_src>
import functools

import jax
import jax.numpy as jnp
from jax import lax
from jax.experimental import pallas as pl
from jax.experimental.pallas import tpu as pltpu

LANES = 128
SUBLANES = 8
ROW_ALIGN = 32           # row multiple valid for f32 (8), bf16 (16) and int8 (32) streams
EPS = 1e-12
SMALL_INPUT_ELEMS = 1024  # below this, fused XLA beats a pallas_call launch
                          # (production: raise to ~256K elems / 1 MiB)


def _round_up(x, m):
    return (x + m - 1) // m * m


def _tpu_config():
    """(tile_rows_max, num_cores, vmem_limit_bytes) chosen per TPU generation."""
    try:
        kind = jax.devices()[0].device_kind.lower()
    except Exception:
        kind = ""
    if "v7" in kind:
        # 2 TensorCores/chip, 64 MiB physical VMEM: 4 MiB f32 blocks, core-split grid.
        return 8192, 2, 48 << 20
    if "v6" in kind:
        return 8192, 1, 64 << 20
    if "v5" in kind:
        return 4096, 1, 32 << 20
    return 2048, 1, None  # conservative default (also fine for interpret/CPU)


def _fold_rows(x):
    """(tile_rows, LANES) f32 -> (SUBLANES, LANES) via sublane-group folding (VPU adds)."""
    return jnp.sum(x.reshape(-1, SUBLANES, LANES), axis=0)


# --------------------------------------------------------------------------- #
# Kernels
# --------------------------------------------------------------------------- #
def _l1_kernel_nomask(pred_ref, gt_ref, acc_ref, *, n_rows, tile_rows, inner_tiles):
    c = pl.program_id(0)
    i = pl.program_id(1)
    tile = c * inner_tiles + i

    @pl.when(i == 0)
    def _():
        acc_ref[...] = jnp.zeros_like(acc_ref)

    full = (tile + 1) * tile_rows <= n_rows  # every row of this block is real

    @pl.when(full)
    def _():
        p = pred_ref[...].astype(jnp.float32)
        g = gt_ref[...].astype(jnp.float32)
        acc_ref[...] += _fold_rows(jnp.abs(p - g))

    @pl.when(jnp.logical_not(full))
    def _():
        # Only the single partial / clamped tile pays for the iota + select.
        row0 = tile * tile_rows
        rows = lax.broadcasted_iota(jnp.int32, (tile_rows, LANES), 0) + row0
        in_bounds = rows < n_rows
        p = pred_ref[...].astype(jnp.float32)
        g = gt_ref[...].astype(jnp.float32)
        acc_ref[...] += _fold_rows(jnp.where(in_bounds, jnp.abs(p - g), 0.0))


def _l1_kernel_masked(pred_ref, gt_ref, mask_ref, acc_ref, macc_ref,
                      *, n_rows, tile_rows, inner_tiles):
    c = pl.program_id(0)
    i = pl.program_id(1)
    tile = c * inner_tiles + i

    @pl.when(i == 0)
    def _():
        acc_ref[...] = jnp.zeros_like(acc_ref)
        macc_ref[...] = jnp.zeros_like(macc_ref)

    full = (tile + 1) * tile_rows <= n_rows

    @pl.when(full)
    def _():
        p = pred_ref[...].astype(jnp.float32)
        g = gt_ref[...].astype(jnp.float32)
        m = mask_ref[...].astype(jnp.float32)
        acc_ref[...] += _fold_rows(jnp.abs(p - g) * m)
        macc_ref[...] += _fold_rows(m)

    @pl.when(jnp.logical_not(full))
    def _():
        row0 = tile * tile_rows
        rows = lax.broadcasted_iota(jnp.int32, (tile_rows, LANES), 0) + row0
        in_bounds = rows < n_rows
        p = pred_ref[...].astype(jnp.float32)
        g = gt_ref[...].astype(jnp.float32)
        m = jnp.where(in_bounds, mask_ref[...].astype(jnp.float32), 0.0)
        acc_ref[...] += _fold_rows(jnp.where(in_bounds, jnp.abs(p - g), 0.0) * m)
        macc_ref[...] += _fold_rows(m)


# --------------------------------------------------------------------------- #
# Wrappers
# --------------------------------------------------------------------------- #
def _as_lane_slab(flat):
    """1-D array -> lane-dense (n_rows, 128); tiny zero-pad only if numel % 128 != 0."""
    n = flat.shape[0]
    rem = n % LANES
    if rem:  # < 128 padded elems; |0-0| = 0 and mask pad = 0, so they never contribute
        flat = jnp.pad(flat, (0, LANES - rem))
    return flat.reshape(-1, LANES)


def _grid_args(n_rows, tile_rows, num_cores):
    total_tiles = pl.cdiv(n_rows, tile_rows)
    inner_tiles = pl.cdiv(total_tiles, num_cores)
    last = total_tiles - 1

    def in_map(c, i):
        # Clamp so a fully-out-of-range tile (uneven core split) re-reads the last
        # real block; its contribution is zeroed by the in-kernel row mask.
        return (jnp.minimum(c * inner_tiles + i, last), 0)

    return inner_tiles, in_map


def _pick_tile_rows(n_rows, tile_rows_max, override):
    if override is not None:
        return _round_up(int(override), ROW_ALIGN)
    return min(tile_rows_max, max(ROW_ALIGN, _round_up(n_rows, ROW_ALIGN)))


@functools.partial(jax.jit, static_argnames=("tile_rows_override",))
def _l1_sum_nomask(pred, gt, tile_rows_override=None):
    tile_rows_max, num_cores, vmem_limit = _tpu_config()
    pred2d = _as_lane_slab(pred.reshape(-1))
    gt2d = _as_lane_slab(gt.reshape(-1))
    n_rows = pred2d.shape[0]
    tile_rows = _pick_tile_rows(n_rows, tile_rows_max, tile_rows_override)
    inner_tiles, in_map = _grid_args(n_rows, tile_rows, num_cores)
    kernel = functools.partial(_l1_kernel_nomask, n_rows=n_rows,
                               tile_rows=tile_rows, inner_tiles=inner_tiles)
    bytes_accessed = pred2d.size * pred2d.dtype.itemsize + gt2d.size * gt2d.dtype.itemsize
    acc = pl.pallas_call(
        kernel,
        out_shape=jax.ShapeDtypeStruct((num_cores, SUBLANES, LANES), jnp.float32),
        grid_spec=pltpu.PrefetchScalarGridSpec(
            num_scalar_prefetch=0,
            grid=(num_cores, inner_tiles),
            in_specs=[
                pl.BlockSpec((tile_rows, LANES), in_map),
                pl.BlockSpec((tile_rows, LANES), in_map),
            ],
            out_specs=pl.BlockSpec((None, SUBLANES, LANES), lambda c, i: (c, 0, 0)),
        ),
        compiler_params=pltpu.CompilerParams(
            dimension_semantics=("parallel", "arbitrary"),
            vmem_limit_bytes=vmem_limit),
        cost_estimate=pl.CostEstimate(
            flops=3 * pred2d.size, transcendentals=0, bytes_accessed=bytes_accessed),
    )(pred2d, gt2d)
    return jnp.sum(acc)


@functools.partial(jax.jit, static_argnames=("tile_rows_override",))
def _l1_sums_masked(pred, gt, mask, tile_rows_override=None):
    tile_rows_max, num_cores, vmem_limit = _tpu_config()
    pred2d = _as_lane_slab(pred.reshape(-1))
    gt2d = _as_lane_slab(gt.reshape(-1))
    mask2d = _as_lane_slab(mask.reshape(-1))
    n_rows = pred2d.shape[0]
    tile_rows = _pick_tile_rows(n_rows, tile_rows_max, tile_rows_override)
    inner_tiles, in_map = _grid_args(n_rows, tile_rows, num_cores)
    kernel = functools.partial(_l1_kernel_masked, n_rows=n_rows,
                               tile_rows=tile_rows, inner_tiles=inner_tiles)
    bytes_accessed = sum(a.size * a.dtype.itemsize for a in (pred2d, gt2d, mask2d))
    acc, macc = pl.pallas_call(
        kernel,
        out_shape=(
            jax.ShapeDtypeStruct((num_cores, SUBLANES, LANES), jnp.float32),
            jax.ShapeDtypeStruct((num_cores, SUBLANES, LANES), jnp.float32),
        ),
        grid_spec=pltpu.PrefetchScalarGridSpec(
            num_scalar_prefetch=0,
            grid=(num_cores, inner_tiles),
            in_specs=[
                pl.BlockSpec((tile_rows, LANES), in_map),
                pl.BlockSpec((tile_rows, LANES), in_map),
                pl.BlockSpec((tile_rows, LANES), in_map),
            ],
            out_specs=[
                pl.BlockSpec((None, SUBLANES, LANES), lambda c, i: (c, 0, 0)),
                pl.BlockSpec((None, SUBLANES, LANES), lambda c, i: (c, 0, 0)),
            ],
        ),
        compiler_params=pltpu.CompilerParams(
            dimension_semantics=("parallel", "arbitrary"),
            vmem_limit_bytes=vmem_limit),
        cost_estimate=pl.CostEstimate(
            flops=5 * pred2d.size, transcendentals=0, bytes_accessed=bytes_accessed),
    )(pred2d, gt2d, mask2d)
    return jnp.sum(acc), jnp.sum(macc)


def _l1_small(pred, gt, valid):
    """Plain-XLA fast path for tiny inputs (pallas launch overhead dominates there)."""
    diff = jnp.abs(pred.astype(jnp.float32) - gt.astype(jnp.float32))
    if valid is None:
        return jnp.mean(diff)
    vf = valid.astype(jnp.float32)
    elem_ratio = pred.size / valid.size
    return (diff * vf).sum() / (vf.sum() * elem_ratio + EPS)


def l1_loss(pred, gt, valid=None, boundary_ignore=None):
    """Pallas equivalent of L1.forward(pred, gt, valid)."""
    if boundary_ignore is not None:
        b = boundary_ignore
        pred = pred[..., b:-b, b:-b]
        gt = gt[..., b:-b, b:-b]
        if valid is not None:
            valid = valid[..., b:-b, b:-b]

    if gt.dtype != pred.dtype:
        gt = gt.astype(pred.dtype)

    if pred.size < SMALL_INPUT_ELEMS:
        return _l1_small(pred, gt, valid)

    if valid is None:
        # F.l1_loss mean reduction: sum(|pred-gt|) / numel (no mask stream at all).
        abs_sum = _l1_sum_nomask(pred, gt)
        return abs_sum / jnp.float32(pred.size)

    # torch broadcasts (|pred-gt| * valid.float()); the reference denominator
    # valid.sum() * (pred.numel()/valid.numel()) + eps equals broadcast_mask.sum() + eps.
    # TODO(synk): stream a broadcastable `valid` through its own BlockSpec (index_map
    # repeating over broadcast dims) instead of materializing a pred-sized copy.
    if valid.shape != pred.shape:
        valid = jnp.broadcast_to(valid, pred.shape)
    if jnp.issubdtype(valid.dtype, jnp.floating):
        mask = valid                     # keep native float dtype (cast to f32 in-kernel)
    else:
        mask = valid.astype(jnp.int8)    # bool / 0-1 int -> 1-byte stream (assumed binary)

    abs_sum, mask_sum = _l1_sums_masked(pred, gt, mask)
    return abs_sum / (mask_sum + jnp.float32(EPS))


if __name__ == "__main__":
    key = jax.random.PRNGKey(0)
    k1, k2, k3, k4 = jax.random.split(key, 4)

    # Small NCHW-like shapes, matching the module's usage (2048 elems -> pallas path).
    pred = jax.random.normal(k1, (2, 4, 16, 16), dtype=jnp.float32)
    gt = jax.random.normal(k2, (2, 4, 16, 16), dtype=jnp.float32)
    valid = jax.random.uniform(k3, (2, 4, 16, 16)) > 0.3
    valid_bcast = jax.random.uniform(k4, (2, 1, 16, 16)) > 0.5

    # 1) valid=None path (plain mean L1; single partial-tile pallas step)
    out_plain = l1_loss(pred, gt)
    jax.block_until_ready(out_plain)
    ref_plain = jnp.mean(jnp.abs(pred - gt))
    assert jnp.allclose(out_plain, ref_plain, rtol=1e-5, atol=1e-6), (out_plain, ref_plain)

    # 2) masked path (valid.shape == pred.shape, bool mask -> int8 stream)
    out_masked = l1_loss(pred, gt, valid=valid)
    jax.block_until_ready(out_masked)
    vf = valid.astype(jnp.float32)
    ref_masked = (jnp.abs(pred - gt) * vf).sum() / (vf.sum() * 1.0 + 1e-12)
    assert jnp.allclose(out_masked, ref_masked, rtol=1e-5, atol=1e-6), (out_masked, ref_masked)

    # 3) boundary_ignore path
    out_bi = l1_loss(pred, gt, boundary_ignore=2)
    jax.block_until_ready(out_bi)
    ref_bi = jnp.mean(jnp.abs(pred[..., 2:-2, 2:-2] - gt[..., 2:-2, 2:-2]))
    assert jnp.allclose(out_bi, ref_bi, rtol=1e-5, atol=1e-6), (out_bi, ref_bi)

    # 4) broadcasting valid (torch semantics: |pred-gt| * valid broadcasts)
    out_bc = l1_loss(pred, gt, valid=valid_bcast)
    jax.block_until_ready(out_bc)
    vbf = valid_bcast.astype(jnp.float32)
    elem_ratio = pred.size / valid_bcast.size
    ref_bc = (jnp.abs(pred - gt) * vbf).sum() / (vbf.sum() * elem_ratio + 1e-12)
    assert jnp.allclose(out_bc, ref_bc, rtol=1e-5, atol=1e-6), (out_bc, ref_bc)

    # 5) multi-tile accumulation: force a small tile so the grid has several steps
    #    (exercises the mask-free full-tile branch, accumulation, and clamped tiles).
    pred_l = jax.random.normal(k1, (2, 4, 48, 64), dtype=jnp.float32)   # 192 rows of 128 lanes
    gt_l = jax.random.normal(k2, (2, 4, 48, 64), dtype=jnp.float32)
    out_l = _l1_sum_nomask(pred_l, gt_l, tile_rows_override=64) / jnp.float32(pred_l.size)
    jax.block_until_ready(out_l)
    ref_l = jnp.mean(jnp.abs(pred_l - gt_l))
    assert jnp.allclose(out_l, ref_l, rtol=1e-5, atol=1e-6), (out_l, ref_l)

    print("KERNEL_OK")
</pallas_src>

<mosaic_0001>
module attributes {stable_mosaic.version = 11 : i64} {
  func.func @_l1_kernel_nomask(%arg0: i32, %arg1: i32, %arg2: memref<32x128xf32, #tpu.memory_space<vmem>>, %arg3: memref<32x128xf32, #tpu.memory_space<vmem>>, %arg4: memref<1x8x128xf32, #tpu.memory_space<vmem>>) attributes {dimension_semantics = [#tpu.dimension_semantics<parallel>, #tpu.dimension_semantics<arbitrary>], iteration_bounds = array<i64: 1, 1>, scalar_prefetch = 0 : i64, scratch_operands = 0 : i64, tpu.core_type = #tpu.core_type<tc>, window_params = [{transform_indices = @transform_0, window_bounds = array<i64: 32, 128>}, {transform_indices = @transform_1, window_bounds = array<i64: 32, 128>}, {transform_indices = @transform_2, window_bounds = array<i64: 1, 8, 128>}]} {
    %c1_i32 = arith.constant 1 : i32
    %0 = arith.muli %arg0, %c1_i32 : i32
    %1 = arith.addi %0, %arg1 : i32
    %c0_i32 = arith.constant 0 : i32
    %2 = arith.cmpi eq, %arg1, %c0_i32 : i32
    %3 = arith.extui %2 : i1 to i32
    %c0_i32_0 = arith.constant 0 : i32
    %4 = arith.cmpi ne, %3, %c0_i32_0 : i32
    scf.if %4 {
      %cst = arith.constant 0.000000e+00 : f32
      %13 = vector.broadcast %cst : f32 to vector<8x128xf32>
      %c0 = arith.constant 0 : index
      %c0_4 = arith.constant 0 : index
      %c0_5 = arith.constant 0 : index
      %14 = vector.load %arg4[%c0, %c0_4, %c0_5] : memref<1x8x128xf32, #tpu.memory_space<vmem>>, vector<1x8x128xf32>
      %15 = vector.shape_cast %14 : vector<1x8x128xf32> to vector<8x128xf32>
      %16 = vector.shape_cast %13 : vector<8x128xf32> to vector<1x8x128xf32>
      tpu.vector_store %arg4[%c0, %c0_4, %c0_5], %16 {strides = array<i32>} : memref<1x8x128xf32, #tpu.memory_space<vmem>>, vector<1x8x128xf32>,
    } else {
    }
    %c1_i32_1 = arith.constant 1 : i32
    %5 = arith.addi %1, %c1_i32_1 : i32
    %c32_i32 = arith.constant 32 : i32
    %6 = arith.muli %5, %c32_i32 : i32
    %c16_i32 = arith.constant 16 : i32
    %7 = arith.cmpi sle, %6, %c16_i32 : i32
    %8 = arith.extui %7 : i1 to i32
    %c0_i32_2 = arith.constant 0 : i32
    %9 = arith.cmpi ne, %8, %c0_i32_2 : i32
    scf.if %9 {
      %c0 = arith.constant 0 : index
      %c0_4 = arith.constant 0 : index
      %13 = vector.load %arg2[%c0, %c0_4] : memref<32x128xf32, #tpu.memory_space<vmem>>, vector<32x128xf32>
      %c0_5 = arith.constant 0 : index
      %c0_6 = arith.constant 0 : index
      %14 = vector.load %arg3[%c0_5, %c0_6] : memref<32x128xf32, #tpu.memory_space<vmem>>, vector<32x128xf32>
      %c0_7 = arith.constant 0 : index
      %c0_8 = arith.constant 0 : index
      %c0_9 = arith.constant 0 : index
      %15 = vector.load %arg4[%c0_7, %c0_8, %c0_9] : memref<1x8x128xf32, #tpu.memory_space<vmem>>, vector<1x8x128xf32>
      %16 = vector.shape_cast %15 : vector<1x8x128xf32> to vector<8x128xf32>
      %17 = arith.subf %13, %14 : vector<32x128xf32>
      %18 = math.absf %17 : vector<32x128xf32>
      %19 = vector.shape_cast %18 : vector<32x128xf32> to vector<4x8x128xf32>
      %cst = arith.constant dense<0.000000e+00> : vector<8x128xf32>
      %20 = vector.multi_reduction <add>, %19, %cst [0] : vector<4x8x128xf32> to vector<8x128xf32>
      %21 = arith.addf %16, %20 : vector<8x128xf32>
      %c0_10 = arith.constant 0 : index
      %c0_11 = arith.constant 0 : index
      %c0_12 = arith.constant 0 : index
      %22 = vector.load %arg4[%c0_10, %c0_11, %c0_12] : memref<1x8x128xf32, #tpu.memory_space<vmem>>, vector<1x8x128xf32>
      %23 = vector.shape_cast %22 : vector<1x8x128xf32> to vector<8x128xf32>
      %24 = vector.shape_cast %21 : vector<8x128xf32> to vector<1x8x128xf32>
      tpu.vector_store %arg4[%c0_10, %c0_11, %c0_12], %24 {strides = array<i32>} : memref<1x8x128xf32, #tpu.memory_space<vmem>>, vector<1x8x128xf32>,
    } else {
    }
    %true = arith.constant true
    %10 = arith.xori %7, %true : i1
    %11 = arith.extui %10 : i1 to i32
    %c0_i32_3 = arith.constant 0 : i32
    %12 = arith.cmpi ne, %11, %c0_i32_3 : i32
    scf.if %12 {
      %c32_i32_4 = arith.constant 32 : i32
      %13 = arith.muli %1, %c32_i32_4 : i32
      %14 = tpu.iota {dimensions = array<i32: 0>} : vector<32x128xi32>
      %15 = vector.broadcast %13 : i32 to vector<32x128xi32>
      %16 = arith.addi %14, %15 : vector<32x128xi32>
      %c16_i32_5 = arith.constant 16 : i32
      %17 = vector.broadcast %c16_i32_5 : i32 to vector<32x128xi32>
      %18 = arith.cmpi slt, %16, %17 : vector<32x128xi32>
      %c0 = arith.constant 0 : index
      %c0_6 = arith.constant 0 : index
      %19 = vector.load %arg2[%c0, %c0_6] : memref<32x128xf32, #tpu.memory_space<vmem>>, vector<32x128xf32>
      %c0_7 = arith.constant 0 : index
      %c0_8 = arith.constant 0 : index
      %20 = vector.load %arg3[%c0_7, %c0_8] : memref<32x128xf32, #tpu.memory_space<vmem>>, vector<32x128xf32>
      %c0_9 = arith.constant 0 : index
      %c0_10 = arith.constant 0 : index
      %c0_11 = arith.constant 0 : index
      %21 = vector.load %arg4[%c0_9, %c0_10, %c0_11] : memref<1x8x128xf32, #tpu.memory_space<vmem>>, vector<1x8x128xf32>
      %22 = vector.shape_cast %21 : vector<1x8x128xf32> to vector<8x128xf32>
      %23 = arith.subf %19, %20 : vector<32x128xf32>
      %24 = math.absf %23 : vector<32x128xf32>
      %cst = arith.constant 0.000000e+00 : f32
      %25 = vector.broadcast %cst : f32 to vector<32x128xf32>
      %26 = arith.select %18, %24, %25 : vector<32x128xi1>, vector<32x128xf32>
      %27 = vector.shape_cast %26 : vector<32x128xf32> to vector<4x8x128xf32>
      %cst_12 = arith.constant dense<0.000000e+00> : vector<8x128xf32>
      %28 = vector.multi_reduction <add>, %27, %cst_12 [0] : vector<4x8x128xf32> to vector<8x128xf32>
      %29 = arith.addf %22, %28 : vector<8x128xf32>
      %c0_13 = arith.constant 0 : index
      %c0_14 = arith.constant 0 : index
      %c0_15 = arith.constant 0 : index
      %30 = vector.load %arg4[%c0_13, %c0_14, %c0_15] : memref<1x8x128xf32, #tpu.memory_space<vmem>>, vector<1x8x128xf32>
      %31 = vector.shape_cast %30 : vector<1x8x128xf32> to vector<8x128xf32>
      %32 = vector.shape_cast %29 : vector<8x128xf32> to vector<1x8x128xf32>
      tpu.vector_store %arg4[%c0_13, %c0_14, %c0_15], %32 {strides = array<i32>} : memref<1x8x128xf32, #tpu.memory_space<vmem>>, vector<1x8x128xf32>,
    } else {
    }
    return
  }
  func.func @transform_0(%arg0: i32, %arg1: i32) -> (i32, i32) {
    %c1_i32 = arith.constant 1 : i32
    %0 = arith.muli %arg0, %c1_i32 : i32
    %1 = arith.addi %0, %arg1 : i32
    %c0_i32 = arith.constant 0 : i32
    %2 = arith.minsi %1, %c0_i32 : i32
    %c0_i32_0 = arith.constant 0 : i32
    %c0_i32_1 = arith.constant 0 : i32
    return %2, %c0_i32_0 : i32, i32
  }
  func.func @transform_1(%arg0: i32, %arg1: i32) -> (i32, i32) {
    %c1_i32 = arith.constant 1 : i32
    %0 = arith.muli %arg0, %c1_i32 : i32
    %1 = arith.addi %0, %arg1 : i32
    %c0_i32 = arith.constant 0 : i32
    %2 = arith.minsi %1, %c0_i32 : i32
    %c0_i32_0 = arith.constant 0 : i32
    %c0_i32_1 = arith.constant 0 : i32
    return %2, %c0_i32_0 : i32, i32
  }
  func.func @transform_2(%arg0: i32, %arg1: i32) -> (i32, i32, i32) {
    %c0_i32 = arith.constant 0 : i32
    %c0_i32_0 = arith.constant 0 : i32
    %c0_i32_1 = arith.constant 0 : i32
    return %arg0, %c0_i32, %c0_i32_0 : i32, i32, i32
  }
}

</mosaic_0001>

<bundles_post_ra>
// kernel: _l1_sum_nomask.1
= control target key start
LH: loop header
LB: loop body
LE: loop exit
PB: predicated region body
PF: predicated region fallthrough
CT: control target
= control target key end

     0   :  { %s221_s0 = inlined_call_operand.vmem [shape: f32[16,128], index: 0, kind: input, shape index: {}]   ;;  %s222_s1 = inlined_call_operand.vmem [shape: f32[16,128], index: 1, kind: input, shape index: {}]   ;;  %s223_s2 = inlined_call_operand.vmem [shape: f32[1,8,128], index: 2, kind: output, shape index: {}]  }
   0x1   :  { %v148_v0 = vld [vmem:[%s221_s0] sm:$0xff]  ;;  %v149_v1 = vld [vmem:[%s221_s0 + $0x8] sm:$0xff] }
   0x2   :  { %v152_v2 = vld [vmem:[%s222_s1] sm:$0xff]  ;;  %v153_v3 = vld [vmem:[%s222_s1 + $0x8] sm:$0xff] }
   0x3   :  { %v157_v4 = vsub.f32 %v148_v0, %v152_v2  ;;  %v158_v5 = vsub.f32 %v149_v1, %v153_v3 }
   0x5   :  { %v161_v6 = vand.u32 2147483647, %v157_v4  ;;  %v162_v7 = vand.u32 2147483647, %v158_v5 }
   0x7   :  { %v169_v8 = vadd.f32 %v162_v7, %v161_v6 }
   0x9   :  { %173 = vst [vmem:[%s223_s2] sm:$0xff] %v169_v8 }

</bundles_post_ra>
